<compile_context>
chip_gen: v5e
topology: v5e:2x2
jax: 0.10.0
libtpu: 0.0.40
codegen_flags: <defaults>
</compile_context>

<pallas_src>
import functools

import jax
import jax.numpy as jnp
from jax.experimental import pallas as pl
from jax.experimental.pallas import tpu as pltpu


# ----------------------------------------------------------------------------
# Pallas kernel: fused Linear -> ReLU -> Linear on one block of batch rows.
# ----------------------------------------------------------------------------
def classifier_mlp_kernel(x_ref, w1_ref, b1_ref, w2_ref, b2_ref, o_ref):
    # x_ref : (block_b, F_in)
    # w1_ref: (F_in, H)      b1_ref: (1, H)
    # w2_ref: (H, O_pad)     b2_ref: (1, O_pad)
    # o_ref : (block_b, O_pad)
    h = jnp.dot(x_ref[...], w1_ref[...], preferred_element_type=jnp.float32)
    h = jnp.maximum(h + b1_ref[...], 0.0)                       # ReLU (VPU)
    y = jnp.dot(h, w2_ref[...], preferred_element_type=jnp.float32) + b2_ref[...]
    o_ref[...] = y.astype(o_ref.dtype)


# ----------------------------------------------------------------------------
# Wrapper: padding + pallas_call plumbing.
# ----------------------------------------------------------------------------
def _round_up(x, m):
    return ((x + m - 1) // m) * m


@functools.partial(jax.jit, static_argnames=("block_b",))
def classifier_forward(x, params, *, block_b=128):
    """x: (B, num_feats) -> (B, out_features)."""
    B, F_in = x.shape
    H = params["w1"].shape[1]
    O = params["w2"].shape[1]

    # --- pad batch rows to a multiple of block_b (sublane-friendly tiles) ---
    Bp = _round_up(B, block_b)
    x_p = jnp.pad(x, ((0, Bp - B), (0, 0))) if Bp != B else x

    # --- pad output features to a multiple of 128 lanes for unmasked stores ---
    Op = _round_up(O, 128)
    if Op != O:
        w2_p = jnp.pad(params["w2"], ((0, 0), (0, Op - O)))
        b2_p = jnp.pad(params["b2"], ((0, 0), (0, Op - O)))
    else:
        w2_p, b2_p = params["w2"], params["b2"]

    grid = (Bp // block_b,)
    out = pl.pallas_call(
        classifier_mlp_kernel,
        out_shape=jax.ShapeDtypeStruct((Bp, Op), jnp.float32),
        grid=grid,
        in_specs=[
            pl.BlockSpec((block_b, F_in), lambda i: (i, 0)),   # x rows
            pl.BlockSpec((F_in, H), lambda i: (0, 0)),         # W1 (resident)
            pl.BlockSpec((1, H), lambda i: (0, 0)),            # b1 (resident)
            pl.BlockSpec((H, Op), lambda i: (0, 0)),           # W2 (resident)
            pl.BlockSpec((1, Op), lambda i: (0, 0)),           # b2 (resident)
        ],
        out_specs=pl.BlockSpec((block_b, Op), lambda i: (i, 0)),
        compiler_params=pltpu.CompilerParams(
            dimension_semantics=("parallel",),                 # megacore on v7x
        ),
    )(x_p, params["w1"], params["b1"], w2_p, b2_p)

    return out[:B, :O]


# ----------------------------------------------------------------------------
# Pure-JAX reference (correctness check only)
# ----------------------------------------------------------------------------
def classifier_ref(x, params):
    h = jax.nn.relu(x @ params["w1"] + params["b1"])
    return h @ params["w2"] + params["b2"]


# ----------------------------------------------------------------------------
# Deterministic parameter init (mirrors torch.nn.Linear default init)
# ----------------------------------------------------------------------------
def _uniform(key, shape, bound):
    return jax.random.uniform(key, shape, jnp.float32, -bound, bound)


def make_params(key, num_feats, cls_feats, out_features):
    k1, k2, k3, k4 = jax.random.split(key, 4)
    b1 = 1.0 / float(num_feats) ** 0.5
    b2 = 1.0 / float(cls_feats) ** 0.5
    return {
        # stored transposed relative to torch (in, out) so the kernel does x @ W
        "w1": _uniform(k1, (num_feats, cls_feats), b1),
        "b1": _uniform(k2, (1, cls_feats), b1),
        "w2": _uniform(k3, (cls_feats, out_features), b2),
        "b2": _uniform(k4, (1, out_features), b2),
    }


if __name__ == "__main__":
    import numpy as np

    # Small shapes consistent with the module: x is (num_nodes, num_feats).
    B = 256            # batch of node embeddings fed to the classifier head
    num_feats = 64     # in_features
    cls_feats = 128    # args.gcn_parameters['cls_feats']
    out_features = 2

    key = jax.random.PRNGKey(0)
    k_x, k_p = jax.random.split(key)

    x = jax.random.normal(k_x, (B, num_feats), jnp.float32)
    params = make_params(k_p, num_feats, cls_feats, out_features)

    out = classifier_forward(x, params, block_b=128)
    out = jax.block_until_ready(out)

    ref = classifier_ref(x, params)
    assert out.shape == (B, out_features), out.shape
    np.testing.assert_allclose(np.asarray(out), np.asarray(ref), rtol=1e-5, atol=1e-5)

    print("KERNEL_OK")
</pallas_src>

<mosaic_0001>
module attributes {stable_mosaic.version = 11 : i64} {
  func.func @classifier_mlp_kernel(%arg0: i32, %arg1: memref<128x64xf32, #tpu.memory_space<vmem>>, %arg2: memref<64x128xf32, #tpu.memory_space<vmem>>, %arg3: memref<1x128xf32, #tpu.memory_space<vmem>>, %arg4: memref<128x128xf32, #tpu.memory_space<vmem>>, %arg5: memref<1x128xf32, #tpu.memory_space<vmem>>, %arg6: memref<128x128xf32, #tpu.memory_space<vmem>>) attributes {dimension_semantics = [#tpu.dimension_semantics<parallel>], iteration_bounds = array<i64: 2>, scalar_prefetch = 0 : i64, scratch_operands = 0 : i64, tpu.core_type = #tpu.core_type<tc>, window_params = [{transform_indices = @transform_0, window_bounds = array<i64: 128, 64>}, {pipeline_mode = #tpu.pipeline_mode<synchronous>, transform_indices = @transform_1, window_bounds = array<i64: 64, 128>}, {pipeline_mode = #tpu.pipeline_mode<synchronous>, transform_indices = @transform_2, window_bounds = array<i64: 1, 128>}, {pipeline_mode = #tpu.pipeline_mode<synchronous>, transform_indices = @transform_3, window_bounds = array<i64: 128, 128>}, {pipeline_mode = #tpu.pipeline_mode<synchronous>, transform_indices = @transform_4, window_bounds = array<i64: 1, 128>}, {transform_indices = @transform_5, window_bounds = array<i64: 128, 128>}]} {
    %c0 = arith.constant 0 : index
    %c0_0 = arith.constant 0 : index
    %0 = vector.load %arg1[%c0, %c0_0] : memref<128x64xf32, #tpu.memory_space<vmem>>, vector<128x64xf32>
    %c0_1 = arith.constant 0 : index
    %c0_2 = arith.constant 0 : index
    %1 = vector.load %arg2[%c0_1, %c0_2] : memref<64x128xf32, #tpu.memory_space<vmem>>, vector<64x128xf32>
    %cst = arith.constant dense<0.000000e+00> : vector<128x128xf32>
    %2 = tpu.matmul %0, %1, %cst {dimension_numbers = #tpu.dot_dimension_numbers<[1], [0], [0], [1], [0, 0, 1, 1], [], []>} : vector<128x64xf32>, vector<64x128xf32>, vector<128x128xf32> -> vector<128x128xf32>
    %c0_3 = arith.constant 0 : index
    %c0_4 = arith.constant 0 : index
    %3 = vector.load %arg3[%c0_3, %c0_4] : memref<1x128xf32, #tpu.memory_space<vmem>>, vector<1x128xf32>
    %4 = vector.broadcast %3 : vector<1x128xf32> to vector<128x128xf32>
    %5 = arith.addf %2, %4 : vector<128x128xf32>
    %cst_5 = arith.constant 0.000000e+00 : f32
    %6 = vector.broadcast %cst_5 : f32 to vector<128x128xf32>
    %7 = arith.maximumf %5, %6 : vector<128x128xf32>
    %c0_6 = arith.constant 0 : index
    %c0_7 = arith.constant 0 : index
    %8 = vector.load %arg4[%c0_6, %c0_7] : memref<128x128xf32, #tpu.memory_space<vmem>>, vector<128x128xf32>
    %cst_8 = arith.constant dense<0.000000e+00> : vector<128x128xf32>
    %9 = tpu.matmul %7, %8, %cst_8 {dimension_numbers = #tpu.dot_dimension_numbers<[1], [0], [0], [1], [0, 0, 1, 1], [], []>} : vector<128x128xf32>, vector<128x128xf32>, vector<128x128xf32> -> vector<128x128xf32>
    %c0_9 = arith.constant 0 : index
    %c0_10 = arith.constant 0 : index
    %10 = vector.load %arg5[%c0_9, %c0_10] : memref<1x128xf32, #tpu.memory_space<vmem>>, vector<1x128xf32>
    %11 = vector.broadcast %10 : vector<1x128xf32> to vector<128x128xf32>
    %12 = arith.addf %9, %11 : vector<128x128xf32>
    %c0_11 = arith.constant 0 : index
    %c0_12 = arith.constant 0 : index
    %13 = vector.load %arg6[%c0_11, %c0_12] : memref<128x128xf32, #tpu.memory_space<vmem>>, vector<128x128xf32>
    tpu.vector_store %arg6[%c0_11, %c0_12], %12 {strides = array<i32>} : memref<128x128xf32, #tpu.memory_space<vmem>>, vector<128x128xf32>,
    return
  }
  func.func @transform_0(%arg0: i32) -> (i32, i32) {
    %c0_i32 = arith.constant 0 : i32
    %c0_i32_0 = arith.constant 0 : i32
    return %arg0, %c0_i32 : i32, i32
  }
  func.func @transform_1(%arg0: i32) -> (i32, i32) {
    %c0_i32 = arith.constant 0 : i32
    %c0_i32_0 = arith.constant 0 : i32
    %c0_i32_1 = arith.constant 0 : i32
    return %c0_i32, %c0_i32_0 : i32, i32
  }
  func.func @transform_2(%arg0: i32) -> (i32, i32) {
    %c0_i32 = arith.constant 0 : i32
    %c0_i32_0 = arith.constant 0 : i32
    %c0_i32_1 = arith.constant 0 : i32
    return %c0_i32, %c0_i32_0 : i32, i32
  }
  func.func @transform_3(%arg0: i32) -> (i32, i32) {
    %c0_i32 = arith.constant 0 : i32
    %c0_i32_0 = arith.constant 0 : i32
    %c0_i32_1 = arith.constant 0 : i32
    return %c0_i32, %c0_i32_0 : i32, i32
  }
  func.func @transform_4(%arg0: i32) -> (i32, i32) {
    %c0_i32 = arith.constant 0 : i32
    %c0_i32_0 = arith.constant 0 : i32
    %c0_i32_1 = arith.constant 0 : i32
    return %c0_i32, %c0_i32_0 : i32, i32
  }
  func.func @transform_5(%arg0: i32) -> (i32, i32) {
    %c0_i32 = arith.constant 0 : i32
    %c0_i32_0 = arith.constant 0 : i32
    return %arg0, %c0_i32 : i32, i32
  }
}

</mosaic_0001>

<bundles_post_ra>
// kernel: classifier_forward.1
= control target key start
LH: loop header
LB: loop body
LE: loop exit
PB: predicated region body
PF: predicated region fallthrough
CT: control target
= control target key end

     0   :  { %s658_s18 = smov 0   ;;  %s812_s0 = inlined_call_operand.vmem [shape: f32[256,64], index: 0, kind: input, shape index: {}]   ;;  %s813_s1 = inlined_call_operand.vmem [shape: f32[64,128], index: 1, kind: input, shape index: {}]   ;;  %s814_s2 = inlined_call_operand.vmem [shape: f32[1,128], index: 2, kind: input, shape index: {}]   ;;  %s815_s3 = inlined_call_operand.vmem [shape: f32[128,128], index: 3, kind: input, shape index: {}]   ;;  %s816_s4 = inlined_call_operand.vmem [shape: f32[1,128], index: 4, kind: input, shape index: {}]   ;;  %s817_s5 = inlined_call_operand.vmem [shape: f32[256,128], index: 5, kind: output, shape index: {}]  }
   0x1 LB: > { %s543_s19 = sadd.s32 4294967295, %s626_s18   ;;  %p547_p0 = scmp.ge.s32.totalorder %s626_s18, 1  ;;  %s626_s18 = sphi %s658_s18, %s15_s18  }
   0x2   : > { %p188_p1 = scmp.lt.s32.totalorder %s626_s18, 3 }
   0x4   : > { %p189_p2 = pnand %p547_p0, %p188_p1 }
   0x5   : > { %s548_s24 = sshll.u32 (!%p189_p2), %s543_s19, 4 }
   0x6   : > { %192 = sbr.rel (%p189_p2) target bundleno = 396 (0x18c), region = 40  ;;  %p217_p3 = scmp.lt.s32.totalorder (!%p189_p2), %s548_s24, 31 }
   0xb   : > { %v251_v0 = vld [vmem:[%s813_s1 + $0x38] sm:$0xff]  ;;  %v250_v1 = vld [vmem:[%s813_s1 + $0x30] sm:$0xff]  ;;  %v249_v2 = vld [vmem:[%s813_s1 + $0x28] sm:$0xff]  ;;  %s819_s24 = smov (!%p217_p3, %s548_s24), 31  ;;  %vm256_vm0 = vcmask 523264  }
   0xc   : > { %313 = vmatpush.msra.mxu0 %v251_v0  ;;  %570 = vmatpush.msra.mxu3 %v251_v0  ;;  %v248_v3 = vld [vmem:[%s813_s1 + $0x20] sm:$0xff]  ;;  %v247_v4 = vld [vmem:[%s813_s1 + $0x18] sm:$0xff]  ;;  %s549_s6 = sshll.u32 %s819_s24, 3  ;;  %v246_v5 = vld [vmem:[%s813_s1 + $0x10] sm:$0xff] }
   0xd   : > { %v245_v6 = vld [vmem:[%s813_s1 + $0x8] sm:$0xff]  ;;  %s695_s13 = scalar_lea.vmem %s812_s0, %s549_s6  ;;  %v244_v7 = vld [vmem:[%s813_s1] sm:$0xff]  ;;  %v401_v16 = vld [vmem:[%s815_s3 + $0x78] sm:$0xff]  ;;  %s791_s10 = scalar_lea.vmem %s817_s5, %s549_s6 }
   0xe   : > { %314 = vmatpush.msra.mxu0 %v250_v1  ;;  %571 = vmatpush.msra.mxu3 %v250_v1  ;;  %v228_v8 = vld [vmem:[%s695_s13] sm:$0xff]  ;;  %v229_v9 = vld [vmem:[%s695_s13 + $0x8] sm:$0xff]  ;;  %v230_v10 = vld [vmem:[%s695_s13 + $0x10] sm:$0xff] }
   0xf   : > { %v237_v11 = vld [vmem:[%s695_s13 + $0x48] sm:$0xff]  ;;  %v231_v12 = vld [vmem:[%s695_s13 + $0x18] sm:$0xff]  ;;  %v238_v13 = vld [vmem:[%s695_s13 + $0x50] sm:$0xff]  ;;  %406 = vmatpush.msra.mxu1 %v401_v16  ;;  %578 = vmatpush.msra.mxu2 %v401_v16 }
  0x10   : > { %315 = vmatpush.msra.mxu0 %v249_v2  ;;  %572 = vmatpush.msra.mxu3 %v249_v2  ;;  %v232_v14 = vld [vmem:[%s695_s13 + $0x20] sm:$0xff]  ;;  %v239_v15 = vld [vmem:[%s695_s13 + $0x58] sm:$0xff]  ;;  %v400_v17 = vld [vmem:[%s815_s3 + $0x70] sm:$0xff] }
  0x11   : > { %v399_v18 = vld [vmem:[%s815_s3 + $0x68] sm:$0xff]  ;;  %407 = vmatpush.msra.mxu1 %v400_v17  ;;  %580 = vmatpush.msra.mxu2 %v400_v17  ;;  %v398_v20 = vld [vmem:[%s815_s3 + $0x60] sm:$0xff]  ;;  %v397_v22 = vld [vmem:[%s815_s3 + $0x58] sm:$0xff] }
  0x12   : > { %316 = vmatpush.msra.mxu0 %v248_v3  ;;  %573 = vmatpush.msra.mxu3 %v248_v3  ;;  %v233_v19 = vld [vmem:[%s695_s13 + $0x28] sm:$0xff]  ;;  %v240_v21 = vld [vmem:[%s695_s13 + $0x60] sm:$0xff]  ;;  %v396_v23 = vld [vmem:[%s815_s3 + $0x50] sm:$0xff] }
  0x13   : > { %408 = vmatpush.msra.mxu1 %v399_v18  ;;  %582 = vmatpush.msra.mxu2 %v399_v18  ;;  %v395_v24 = vld [vmem:[%s815_s3 + $0x48] sm:$0xff]  ;;  %v234_v25 = vld [vmem:[%s695_s13 + $0x30] sm:$0xff]  ;;  %v394_v26 = vld [vmem:[%s815_s3 + $0x40] sm:$0xff] }
  0x14   : > { %317 = vmatpush.msra.mxu0 %v247_v4  ;;  %574 = vmatpush.msra.mxu3 %v247_v4  ;;  %v241_v27 = vld [vmem:[%s695_s13 + $0x68] sm:$0xff]  ;;  %v393_v28 = vld [vmem:[%s815_s3 + $0x38] sm:$0xff]  ;;  %v392_v29 = vld [vmem:[%s815_s3 + $0x30] sm:$0xff] }
  0x15   : > { %409 = vmatpush.msra.mxu1 %v398_v20  ;;  %584 = vmatpush.msra.mxu2 %v398_v20  ;;  %v391_v30 = vld [vmem:[%s815_s3 + $0x28] sm:$0xff]  ;;  %v235_v31 = vld [vmem:[%s695_s13 + $0x38] sm:$0xff]  ;;  %v390_v32 = vld [vmem:[%s815_s3 + $0x20] sm:$0xff] }
  0x16   : > { %318 = vmatpush.msra.mxu0 %v246_v5  ;;  %575 = vmatpush.msra.mxu3 %v246_v5  ;;  %v242_v33 = vld [vmem:[%s695_s13 + $0x70] sm:$0xff]  ;;  %v389_v34 = vld [vmem:[%s815_s3 + $0x18] sm:$0xff]  ;;  %v236_v35 = vld [vmem:[%s695_s13 + $0x40] sm:$0xff] }
  0x17   : > { %410 = vmatpush.msra.mxu1 %v397_v22  ;;  %586 = vmatpush.msra.mxu2 %v397_v22  ;;  %v243_v36 = vld [vmem:[%s695_s13 + $0x78] sm:$0xff]  ;;  %v388_v37 = vld [vmem:[%s815_s3 + $0x10] sm:$0xff]  ;;  %v387_v38 = vld [vmem:[%s815_s3 + $0x8] sm:$0xff] }
  0x18   : > { %319 = vmatpush.msra.mxu0 %v245_v6  ;;  %576 = vmatpush.msra.mxu3 %v245_v6  ;;  %v386_v39 = vld [vmem:[%s815_s3] sm:$0xff] }
  0x19   : > { %411 = vmatpush.msra.mxu1 %v396_v23  ;;  %588 = vmatpush.msra.mxu2 %v396_v23  ;;  %v618_v40 = vld [vmem:[%s814_s2] ss:$0 sm:$0xff] }
  0x1a   : > { %320 = vmatpush.msra.mxu0 %v244_v7  ;;  %577 = vmatpush.msra.mxu3 %v244_v7 }
  0x1b   : > { %552 = vmatmul.msk.f32.vlgmr.msra.gmra.mxu0 %vm256_vm0, %v228_v8  ;;  %561 = vmatmul.msk.f32.vlgmr.msra.gmra.mxu3 %vm256_vm0, %v237_v11 }
  0x1c   : > { %579 = vmatpush.msrb.mxu3 %v401_v16  ;;  %412 = vmatpush.msra.mxu1 %v395_v24 }
  0x1d   : > { %590 = vmatpush.msra.mxu2 %v395_v24 }
  0x1e   : > { %581 = vmatpush.msrb.mxu3 %v400_v17  ;;  %413 = vmatpush.msra.mxu1 %v394_v26 }
  0x1f   : > { %592 = vmatpush.msra.mxu2 %v394_v26 }
  0x20   : > { %583 = vmatpush.msrb.mxu3 %v399_v18  ;;  %414 = vmatpush.msra.mxu1 %v393_v28 }
  0x21   : > { %594 = vmatpush.msra.mxu2 %v393_v28 }
  0x22   : > { %585 = vmatpush.msrb.mxu3 %v398_v20  ;;  %415 = vmatpush.msra.mxu1 %v392_v29 }
  0x23   : > { %553 = vmatmul.msk.f32.gmra.mxu0 %vm256_vm0, %v229_v9  ;;  %562 = vmatmul.msk.f32.gmra.mxu3 %vm256_vm0, %v238_v13 }
  0x24   : > { %587 = vmatpush.msrb.mxu3 %v397_v22  ;;  %596 = vmatpush.msra.mxu2 %v392_v29 }
  0x25   : > { %416 = vmatpush.msra.mxu1 %v391_v30 }
  0x26   : > { %589 = vmatpush.msrb.mxu3 %v396_v23  ;;  %598 = vmatpush.msra.mxu2 %v391_v30 }
  0x27   : > { %417 = vmatpush.msra.mxu1 %v390_v32 }
  0x28   : > { %591 = vmatpush.msrb.mxu3 %v395_v24  ;;  %600 = vmatpush.msra.mxu2 %v390_v32 }
  0x29   : > { %418 = vmatpush.msra.mxu1 %v389_v34 }
  0x2a   : > { %593 = vmatpush.msrb.mxu3 %v394_v26  ;;  %602 = vmatpush.msra.mxu2 %v389_v34 }
  0x2b   : > { %554 = vmatmul.msk.f32.gmra.mxu0 %vm256_vm0, %v230_v10  ;;  %563 = vmatmul.msk.f32.gmra.mxu3 %vm256_vm0, %v239_v15 }
  0x2c   : > { %595 = vmatpush.msrb.mxu3 %v393_v28  ;;  %419 = vmatpush.msra.mxu1 %v388_v37 }
  0x2d   : > { %604 = vmatpush.msra.mxu2 %v388_v37 }
  0x2e   : > { %597 = vmatpush.msrb.mxu3 %v392_v29  ;;  %420 = vmatpush.msra.mxu1 %v387_v38 }
  0x2f   : > { %606 = vmatpush.msra.mxu2 %v387_v38 }
  0x30   : > { %599 = vmatpush.msrb.mxu3 %v391_v30  ;;  %421 = vmatpush.msra.mxu1 %v386_v39 }
  0x31   : > { %608 = vmatpush.msra.mxu2 %v386_v39 }
  0x32   : > { %601 = vmatpush.msrb.mxu3 %v390_v32 }
  0x33   : > { %555 = vmatmul.msk.f32.gmra.mxu0 %vm256_vm0, %v231_v12  ;;  %564 = vmatmul.msk.f32.gmra.mxu3 %vm256_vm0, %v240_v21 }
  0x34   : > { %603 = vmatpush.msrb.mxu3 %v389_v34 }
  0x36   : > { %605 = vmatpush.msrb.mxu3 %v388_v37 }
  0x38   : > { %607 = vmatpush.msrb.mxu3 %v387_v38 }
  0x3a   : > { %609 = vmatpush.msrb.mxu3 %v386_v39 }
  0x3b   : > { %556 = vmatmul.msk.f32.gmra.mxu0 %vm256_vm0, %v232_v14  ;;  %565 = vmatmul.msk.f32.gmra.mxu3 %vm256_vm0, %v241_v27 }
  0x43   : > { %557 = vmatmul.msk.f32.gmra.mxu0 %vm256_vm0, %v233_v19  ;;  %566 = vmatmul.msk.f32.gmra.mxu3 %vm256_vm0, %v242_v33 }
  0x4b   : > { %558 = vmatmul.msk.f32.gmra.mxu0 %vm256_vm0, %v234_v25  ;;  %567 = vmatmul.msk.f32.gmra.mxu3 %vm256_vm0, %v243_v36  ;;  %v619_v25 = vld [vmem:[%s816_s4] ss:$0 sm:$0xff] }
  0x53   : > { %559 = vmatmul.msk.f32.gmra.mxu0 %vm256_vm0, %v235_v31 }
  0x5b   : > { %560 = vmatmul.msk.f32.gmra.mxu0 %vm256_vm0, %v236_v35 }
  0x98   : > { %v322_v41 = vpop.f32.mrf.mxu0 }
  0x99   : > { %v323_v42 = vadd.f32 %v618_v40, %v322_v41 }
  0x9b   : > { %v370_v43 = vmax.f32 %v323_v42, 0.0 }
  0x9d   : > { %422 = vmatmul.f32.vlgmr.msra.gmra.mxu1 %v370_v43 }
  0x9e   : > { %v349_v51 = vpop.f32.mrf.mxu3 }
  0x9f   : > { %v350_v12 = vadd.f32 %v618_v40, %v349_v51 }
  0xa0   : > { %v325_v44 = vpop.f32.mrf.mxu0 }
  0xa1   : > { %v326_v45 = vadd.f32 %v618_v40, %v325_v44  ;;  %v379_v15 = vmax.f32 %v350_v12, 0.0 }
  0xa3   : > { %v371_v46 = vmax.f32 %v326_v45, 0.0 }
  0xa5   : > { %425 = vmatmul.f32.gmra.mxu1 %v371_v46 }
  0xa6   : > { %v352_v55 = vpop.f32.mrf.mxu3 }
  0xa7   : > { %v353_v17 = vadd.f32 %v618_v40, %v352_v55 }
  0xa8   : > { %v328_v47 = vpop.f32.mrf.mxu0 }
  0xa9   : > { %v329_v48 = vadd.f32 %v618_v40, %v328_v47  ;;  %v380_v18 = vmax.f32 %v353_v17, 0.0 }
  0xab   : > { %v372_v49 = vmax.f32 %v329_v48, 0.0 }
  0xad   : > { %428 = vmatmul.f32.gmra.mxu1 %v372_v49 }
  0xae   : > { %v355_v59 = vpop.f32.mrf.mxu3 }
  0xaf   : > { %v356_v19 = vadd.f32 %v618_v40, %v355_v59 }
  0xb0   : > { %v331_v50 = vpop.f32.mrf.mxu0 }
  0xb1   : > { %v332_v52 = vadd.f32 %v618_v40, %v331_v50  ;;  %v381_v20 = vmax.f32 %v356_v19, 0.0 }
  0xb3   : > { %v373_v53 = vmax.f32 %v332_v52, 0.0 }
  0xb5   : > { %431 = vmatmul.f32.gmra.mxu1 %v373_v53 }
  0xb6   : > { %v358_v63 = vpop.f32.mrf.mxu3 }
  0xb7   : > { %v359_v21 = vadd.f32 %v618_v40, %v358_v63 }
  0xb8   : > { %v334_v54 = vpop.f32.mrf.mxu0 }
  0xb9   : > { %v335_v56 = vadd.f32 %v618_v40, %v334_v54  ;;  %v382_v22 = vmax.f32 %v359_v21, 0.0 }
  0xbb   : > { %v374_v57 = vmax.f32 %v335_v56, 0.0 }
  0xbd   : > { %434 = vmatmul.f32.gmra.mxu1 %v374_v57 }
  0xbe   : > { %v361_v3 = vpop.f32.mrf.mxu3 }
  0xbf   : > { %v362_v23 = vadd.f32 %v618_v40, %v361_v3 }
  0xc0   : > { %v337_v58 = vpop.f32.mrf.mxu0 }
  0xc1   : > { %v338_v60 = vadd.f32 %v618_v40, %v337_v58  ;;  %v383_v24 = vmax.f32 %v362_v23, 0.0 }
  0xc3   : > { %v375_v61 = vmax.f32 %v338_v60, 0.0 }
  0xc5   : > { %437 = vmatmul.f32.gmra.mxu1 %v375_v61 }
  0xc6   : > { %v364_v7 = vpop.f32.mrf.mxu3 }
  0xc7   : > { %v365_v9 = vadd.f32 %v618_v40, %v364_v7 }
  0xc8   : > { %v340_v62 = vpop.f32.mrf.mxu0 }
  0xc9   : > { %v341_v0 = vadd.f32 %v618_v40, %v340_v62  ;;  %v384_v11 = vmax.f32 %v365_v9, 0.0 }
  0xcb   : > { %v376_v1 = vmax.f32 %v341_v0, 0.0  ;;  %464 = vmatmul.f32.vlgmr.msrb.gmra.mxu3 %v384_v11 }
  0xcd   : > { %440 = vmatmul.f32.gmra.mxu1 %v376_v1 }
  0xce   : > { %v367_v13 = vpop.f32.mrf.mxu3 }
  0xcf   : > { %v368_v14 = vadd.f32 %v618_v40, %v367_v13 }
  0xd0   : > { %v343_v2 = vpop.f32.mrf.mxu0 }
  0xd1   : > { %v344_v4 = vadd.f32 %v618_v40, %v343_v2  ;;  %v385_v16 = vmax.f32 %v368_v14, 0.0 }
  0xd3   : > { %v377_v5 = vmax.f32 %v344_v4, 0.0  ;;  %467 = vmatmul.f32.gmra.mxu3 %v385_v16 }
  0xd5   : > { %443 = vmatmul.f32.vlgmr.msra.gmra.mxu2 %v377_v5 }
  0xd8   : > { %v346_v6 = vpop.f32.mrf.mxu0 }
  0xd9   : > { %v347_v8 = vadd.f32 %v618_v40, %v346_v6 }
  0xdb   : > { %v378_v10 = vmax.f32 %v347_v8, 0.0 }
  0xdd   : > { %446 = vmatmul.f32.gmra.mxu2 %v378_v10 }
  0xe5   : > { %449 = vmatmul.f32.gmra.mxu2 %v379_v15 }
  0xed   : > { %452 = vmatmul.f32.gmra.mxu2 %v380_v18 }
  0xf5   : > { %455 = vmatmul.f32.gmra.mxu2 %v381_v20 }
  0xfd   : > { %458 = vmatmul.f32.gmra.mxu2 %v382_v22 }
 0x105   : > { %461 = vmatmul.f32.gmra.mxu2 %v383_v24 }
 0x11a   : > { %v423_v26 = vpop.f32.mrf.mxu1 }
 0x11b   : > { %v424_v27 = vadd.f32 %v619_v25, %v423_v26 }
 0x11d   : > { %471 = vst [vmem:[%s791_s10] sm:$0xff] %v424_v27 }
 0x122   : > { %v426_v28 = vpop.f32.mrf.mxu1 }
 0x123   : > { %v427_v29 = vadd.f32 %v619_v25, %v426_v28 }
 0x125   : > { %472 = vst [vmem:[%s791_s10 + $0x8] sm:$0xff] %v427_v29 }
 0x12a   : > { %v429_v30 = vpop.f32.mrf.mxu1 }
 0x12b   : > { %v430_v31 = vadd.f32 %v619_v25, %v429_v30 }
 0x12d   : > { %473 = vst [vmem:[%s791_s10 + $0x10] sm:$0xff] %v430_v31 }
 0x132   : > { %v432_v32 = vpop.f32.mrf.mxu1 }
 0x133   : > { %v433_v33 = vadd.f32 %v619_v25, %v432_v32 }
 0x135   : > { %474 = vst [vmem:[%s791_s10 + $0x18] sm:$0xff] %v433_v33 }
 0x13a   : > { %v435_v34 = vpop.f32.mrf.mxu1 }
 0x13b   : > { %v436_v35 = vadd.f32 %v619_v25, %v435_v34 }
 0x13d   : > { %475 = vst [vmem:[%s791_s10 + $0x20] sm:$0xff] %v436_v35 }
 0x142   : > { %v438_v36 = vpop.f32.mrf.mxu1 }
 0x143   : > { %v439_v37 = vadd.f32 %v619_v25, %v438_v36 }
 0x145   : > { %476 = vst [vmem:[%s791_s10 + $0x28] sm:$0xff] %v439_v37 }
 0x14a   : > { %v441_v38 = vpop.f32.mrf.mxu1 }
 0x14b   : > { %v442_v39 = vadd.f32 %v619_v25, %v441_v38 }
 0x14d   : > { %477 = vst [vmem:[%s791_s10 + $0x30] sm:$0xff] %v442_v39 }
 0x14e   : > { %v465_v43 = vpop.f32.mrf.mxu3 }
 0x14f   : > { %v466_v45 = vadd.f32 %v619_v25, %v465_v43 }
 0x151   : > { %485 = vst [vmem:[%s791_s10 + $0x70] sm:$0xff] %v466_v45 }
 0x156   : > { %v468_v47 = vpop.f32.mrf.mxu3 }
 0x157   : > { %v469_v49 = vadd.f32 %v619_v25, %v468_v47 }
 0x158   : > { %v444_v40 = vpop.f32.mrf.mxu2 }
 0x159   : > { %v445_v41 = vadd.f32 %v619_v25, %v444_v40  ;;  %486 = vst [vmem:[%s791_s10 + $0x78] sm:$0xff] %v469_v49 }
 0x15b   : > { %478 = vst [vmem:[%s791_s10 + $0x38] sm:$0xff] %v445_v41 }
 0x160   : > { %v447_v42 = vpop.f32.mrf.mxu2 }
 0x161   : > { %v448_v44 = vadd.f32 %v619_v25, %v447_v42 }
 0x163   : > { %479 = vst [vmem:[%s791_s10 + $0x40] sm:$0xff] %v448_v44 }
 0x168   : > { %v450_v46 = vpop.f32.mrf.mxu2 }
 0x169   : > { %v451_v48 = vadd.f32 %v619_v25, %v450_v46 }
 0x16b   : > { %480 = vst [vmem:[%s791_s10 + $0x48] sm:$0xff] %v451_v48 }
 0x170   : > { %v453_v50 = vpop.f32.mrf.mxu2 }
 0x171   : > { %v454_v51 = vadd.f32 %v619_v25, %v453_v50 }
 0x173   : > { %481 = vst [vmem:[%s791_s10 + $0x50] sm:$0xff] %v454_v51 }
 0x178   : > { %v456_v52 = vpop.f32.mrf.mxu2 }
 0x179   : > { %v457_v53 = vadd.f32 %v619_v25, %v456_v52 }
 0x17b   : > { %482 = vst [vmem:[%s791_s10 + $0x58] sm:$0xff] %v457_v53 }
 0x180   : > { %v459_v54 = vpop.f32.mrf.mxu2 }
 0x181   : > { %v460_v55 = vadd.f32 %v619_v25, %v459_v54 }
 0x183   : > { %483 = vst [vmem:[%s791_s10 + $0x60] sm:$0xff] %v460_v55 }
 0x188   : > { %v462_v56 = vpop.f32.mrf.mxu2 }
 0x189   : > { %v463_v57 = vadd.f32 %v619_v25, %v462_v56 }
 0x18b   : > { %484 = vst [vmem:[%s791_s10 + $0x68] sm:$0xff] %v463_v57 }
 0x18c PF: > { %s15_s18 = sadd.s32 1, %s626_s18  }
 0x18d   : > { %p12_p4 = scmp.ge.s32.totalorder %s15_s18, 4  }
 0x18f   :  { %14 = sbr.rel (!%p12_p4) target bundleno = 1 (0x1), region = 70 }

</bundles_post_ra>
